<compile_context>
chip_gen: v7x
topology: tpu7x:2x2x1
jax: 0.10.0
libtpu: 0.0.40
codegen_flags: <defaults>
</compile_context>

<pallas_src>
import functools

import jax
import jax.numpy as jnp
from jax.experimental import pallas as pl
from jax.experimental.pallas import tpu as pltpu


def _gat_layer_kernel(h_ref, w_ref, wa_ref, bias_ref, out_ref, *, n_head, f_out):
    h = h_ref[...]                                             # (N, f_in) f32

    # Head-batched projection: bf16 operands, f32 accumulation on the MXU.
    hp_all = jnp.dot(h.astype(jnp.bfloat16),
                     w_ref[...].astype(jnp.bfloat16),
                     preferred_element_type=jnp.float32)       # (N, H*f_out)

    # Folded attention logits: columns [0:H) are attn_src, [H:2H) are attn_dst (f32 path).
    s = jnp.dot(h, wa_ref[...], preferred_element_type=jnp.float32)   # (N, 2H)

    head_outs = []
    for hd in range(n_head):                                   # static unroll, H is small
        attn_src = s[:, hd:hd + 1]                             # (N, 1)
        attn_dst = s[:, n_head + hd:n_head + hd + 1]           # (N, 1)
        logits = attn_src + attn_dst.T                         # (N, N)
        # LeakyReLU(negative_slope=0.2)
        logits = jnp.where(logits >= 0.0, logits, 0.2 * logits)
        # Numerically stable softmax with deferred normalization.
        logits = logits - jnp.max(logits, axis=-1, keepdims=True)
        p = jnp.exp(logits)                                    # unnormalized weights
        row_sum = jnp.sum(p, axis=-1, keepdims=True)           # (N, 1)
        hp = hp_all[:, hd * f_out:(hd + 1) * f_out]            # (N, f_out)
        agg = jnp.dot(p.astype(jnp.bfloat16), hp.astype(jnp.bfloat16),
                      preferred_element_type=jnp.float32)      # (N, f_out)
        head_outs.append(agg * pl.reciprocal(row_sum, approx=True))

    # Node-major output: [head0 | head1 | ...] per node row, single lane-dense store.
    out = jnp.concatenate(head_outs, axis=-1) + bias_ref[...]  # (N, H*f_out)
    out_ref[...] = out.astype(out_ref.dtype)


def gat_layer(h, w, a_src, a_dst, bias):
    """One MultiHeadGraphAttention layer: (N, f_in) -> (N, H*f_out), node-major."""
    N, f_in = h.shape
    n_head, _, f_out = w.shape

    # Head-batched projection weights, head-major along lanes so the kernel output is
    # already torch's permute(1, 0, 2).reshape(bs, -1) layout.
    w_all = jnp.transpose(w, (1, 0, 2)).reshape(f_in, n_head * f_out)
    # Fold a_src/a_dst into the projection: wa_src[:, h] = w[h] @ a_src[h], etc.
    wa_src = jnp.matmul(w, a_src)[..., 0].T                    # (f_in, H)
    wa_dst = jnp.matmul(w, a_dst)[..., 0].T                    # (f_in, H)
    wa = jnp.concatenate([wa_src, wa_dst], axis=1)             # (f_in, 2H)
    # Bias tiled per head so it adds directly to the node-major (N, H*f_out) output.
    bias_all = jnp.tile(bias, n_head).reshape(1, n_head * f_out)

    kernel = functools.partial(_gat_layer_kernel, n_head=n_head, f_out=f_out)

    return pl.pallas_call(
        kernel,
        out_shape=jax.ShapeDtypeStruct((N, n_head * f_out), h.dtype),
        grid_spec=pltpu.PrefetchScalarGridSpec(
            num_scalar_prefetch=0,
            grid=(1,),
            in_specs=[
                pl.BlockSpec((N, f_in), lambda i: (0, 0)),                  # h
                pl.BlockSpec((f_in, n_head * f_out), lambda i: (0, 0)),     # w_all
                pl.BlockSpec((f_in, 2 * n_head), lambda i: (0, 0)),         # wa
                pl.BlockSpec((1, n_head * f_out), lambda i: (0, 0)),        # bias
            ],
            out_specs=pl.BlockSpec((N, n_head * f_out), lambda i: (0, 0)),
        ),
        compiler_params=pltpu.CompilerParams(
            dimension_semantics=("arbitrary",)),
    )(h, w_all, wa, bias_all)


def init_attention_block_params(key, n_units, n_heads):
    """Deterministic parameter init matching the PyTorch module's shapes."""
    n_layer = len(n_units) - 1
    gain = 1.414
    params = []
    for i in range(n_layer):
        f_in = n_units[i] * n_heads[i - 1] if i else n_units[i]
        f_out = n_units[i + 1]
        H = n_heads[i]

        def xavier(k, shape):
            # torch fan calc for >2-D tensors: fan_in = size(1)*rf, fan_out = size(0)*rf
            rf = shape[2] if len(shape) > 2 else 1
            fan_in = shape[1] * rf
            fan_out = shape[0] * rf
            bound = gain * (6.0 / (fan_in + fan_out)) ** 0.5
            return jax.random.uniform(k, shape, jnp.float32, -bound, bound)

        key, k1, k2, k3 = jax.random.split(key, 4)
        params.append(dict(
            w=xavier(k1, (H, f_in, f_out)),
            a_src=xavier(k2, (H, f_out, 1)),
            a_dst=xavier(k3, (H, f_out, 1)),
            bias=jnp.zeros((f_out,), jnp.float32),
        ))
    return params


def attention_block_forward(x, params):
    for p in params:
        x = gat_layer(x, p["w"], p["a_src"], p["a_dst"], p["bias"])
    return x


# ---------------- pure-JAX f32 reference (mirrors the PyTorch forward) ----------------
def _gat_layer_ref(h, w, a_src, a_dst, bias):
    bs = h.shape[0]
    h_prime = jnp.matmul(h, w)                            # (H, N, f_out)
    attn_src = jnp.matmul(h_prime, a_src)                 # (H, N, 1)
    attn_dst = jnp.matmul(h_prime, a_dst)                 # (H, N, 1)
    attn = attn_src + jnp.transpose(attn_dst, (0, 2, 1))  # (H, N, N)
    attn = jnp.where(attn >= 0, attn, 0.2 * attn)
    attn = jax.nn.softmax(attn, axis=-1)
    out = jnp.matmul(attn, h_prime) + bias                # (H, N, f_out)
    return jnp.transpose(out, (1, 0, 2)).reshape(bs, -1)


def _attention_block_ref(x, params):
    for p in params:
        x = _gat_layer_ref(x, p["w"], p["a_src"], p["a_dst"], p["bias"])
    return x


if __name__ == "__main__":
    key = jax.random.PRNGKey(0)

    # Small, module-consistent config: 2 GAT layers.
    n_units = [16, 32, 16]
    n_heads = [4, 2]
    N = 8  # number of nodes ("bs" in the PyTorch code)

    key, kx, kp = jax.random.split(key, 3)
    x = jax.random.normal(kx, (N, n_units[0]), dtype=jnp.float32)
    params = init_attention_block_params(kp, n_units, n_heads)

    out = jax.block_until_ready(attention_block_forward(x, params))
    ref = jax.block_until_ready(_attention_block_ref(x, params))

    assert out.shape == (N, n_heads[-1] * n_units[-1]), out.shape
    # Kernel runs the matmuls with bf16 operands (f32 accumulation) and an approx
    # reciprocal; compare with a scale-normalized max error against the f32 reference.
    err = float(jnp.max(jnp.abs(out - ref)) / (jnp.max(jnp.abs(ref)) + 1e-8))
    assert err < 5e-2, err

    print("KERNEL_OK")
</pallas_src>

<mosaic_0001>
module attributes {stable_mosaic.version = 11 : i64} {
  func.func @_gat_layer_kernel(%arg0: i32, %arg1: memref<8x16xf32, #tpu.memory_space<vmem>>, %arg2: memref<16x128xf32, #tpu.memory_space<vmem>>, %arg3: memref<16x8xf32, #tpu.memory_space<vmem>>, %arg4: memref<1x128xf32, #tpu.memory_space<vmem>>, %arg5: memref<8x128xf32, #tpu.memory_space<vmem>>) attributes {dimension_semantics = [#tpu.dimension_semantics<arbitrary>], iteration_bounds = array<i64: 1>, scalar_prefetch = 0 : i64, scratch_operands = 0 : i64, tpu.core_type = #tpu.core_type<tc>, window_params = [{pipeline_mode = #tpu.pipeline_mode<synchronous>, transform_indices = @transform_0, window_bounds = array<i64: 8, 16>}, {pipeline_mode = #tpu.pipeline_mode<synchronous>, transform_indices = @transform_1, window_bounds = array<i64: 16, 128>}, {pipeline_mode = #tpu.pipeline_mode<synchronous>, transform_indices = @transform_2, window_bounds = array<i64: 16, 8>}, {pipeline_mode = #tpu.pipeline_mode<synchronous>, transform_indices = @transform_3, window_bounds = array<i64: 1, 128>}, {pipeline_mode = #tpu.pipeline_mode<synchronous>, transform_indices = @transform_4, window_bounds = array<i64: 8, 128>}]} {
    %c0 = arith.constant 0 : index
    %c0_0 = arith.constant 0 : index
    %0 = vector.load %arg1[%c0, %c0_0] : memref<8x16xf32, #tpu.memory_space<vmem>>, vector<8x16xf32>
    %1 = arith.truncf %0 : vector<8x16xf32> to vector<8x16xbf16>
    %c0_1 = arith.constant 0 : index
    %c0_2 = arith.constant 0 : index
    %2 = vector.load %arg2[%c0_1, %c0_2] : memref<16x128xf32, #tpu.memory_space<vmem>>, vector<16x128xf32>
    %3 = arith.truncf %2 : vector<16x128xf32> to vector<16x128xbf16>
    %cst = arith.constant dense<0.000000e+00> : vector<8x128xf32>
    %4 = tpu.matmul %1, %3, %cst {dimension_numbers = #tpu.dot_dimension_numbers<[1], [0], [0], [1], [0, 0, 1, 1], [], []>} : vector<8x16xbf16>, vector<16x128xbf16>, vector<8x128xf32> -> vector<8x128xf32>
    %c0_3 = arith.constant 0 : index
    %c0_4 = arith.constant 0 : index
    %5 = vector.load %arg3[%c0_3, %c0_4] : memref<16x8xf32, #tpu.memory_space<vmem>>, vector<16x8xf32>
    %cst_5 = arith.constant dense<0.000000e+00> : vector<8x8xf32>
    %6 = tpu.matmul %0, %5, %cst_5 {dimension_numbers = #tpu.dot_dimension_numbers<[1], [0], [0], [1], [0, 0, 1, 1], [], []>} : vector<8x16xf32>, vector<16x8xf32>, vector<8x8xf32> -> vector<8x8xf32>
    %7 = vector.extract_strided_slice %6 {offsets = [0, 0], sizes = [8, 1], strides = [1, 1]} : vector<8x8xf32> to vector<8x1xf32>
    %8 = vector.extract_strided_slice %6 {offsets = [0, 4], sizes = [8, 1], strides = [1, 1]} : vector<8x8xf32> to vector<8x1xf32>
    %9 = tpu.transpose %8, [1, 0] : vector<8x1xf32> -> vector<1x8xf32>
    %10 = vector.broadcast %7 : vector<8x1xf32> to vector<8x8xf32>
    %11 = vector.broadcast %9 : vector<1x8xf32> to vector<8x8xf32>
    %12 = arith.addf %10, %11 : vector<8x8xf32>
    %cst_6 = arith.constant 0.000000e+00 : f32
    %13 = vector.broadcast %cst_6 : f32 to vector<8x8xf32>
    %14 = arith.cmpf oge, %12, %13 : vector<8x8xf32>
    %cst_7 = arith.constant 2.000000e-01 : f32
    %15 = vector.broadcast %cst_7 : f32 to vector<8x8xf32>
    %16 = arith.mulf %15, %12 : vector<8x8xf32>
    %17 = arith.select %14, %12, %16 : vector<8x8xi1>, vector<8x8xf32>
    %cst_8 = arith.constant dense<0xFF800000> : vector<8xf32>
    %18 = vector.multi_reduction <maximumf>, %17, %cst_8 [1] : vector<8x8xf32> to vector<8xf32>
    %19 = vector.shape_cast %18 : vector<8xf32> to vector<8x1xf32>
    %20 = vector.broadcast %19 : vector<8x1xf32> to vector<8x8xf32>
    %21 = arith.subf %17, %20 : vector<8x8xf32>
    %22 = math.exp %21 : vector<8x8xf32>
    %cst_9 = arith.constant dense<0.000000e+00> : vector<8xf32>
    %23 = vector.multi_reduction <add>, %22, %cst_9 [1] : vector<8x8xf32> to vector<8xf32>
    %24 = vector.shape_cast %23 : vector<8xf32> to vector<8x1xf32>
    %25 = vector.extract_strided_slice %4 {offsets = [0, 0], sizes = [8, 32], strides = [1, 1]} : vector<8x128xf32> to vector<8x32xf32>
    %26 = arith.truncf %22 : vector<8x8xf32> to vector<8x8xbf16>
    %27 = arith.truncf %25 : vector<8x32xf32> to vector<8x32xbf16>
    %cst_10 = arith.constant dense<0.000000e+00> : vector<8x32xf32>
    %28 = tpu.matmul %26, %27, %cst_10 {dimension_numbers = #tpu.dot_dimension_numbers<[1], [0], [0], [1], [0, 0, 1, 1], [], []>} : vector<8x8xbf16>, vector<8x32xbf16>, vector<8x32xf32> -> vector<8x32xf32>
    %29 = tpu.reciprocal %24 {approx = true} : vector<8x1xf32> -> vector<8x1xf32>
    %30 = vector.broadcast %29 : vector<8x1xf32> to vector<8x32xf32>
    %31 = arith.mulf %28, %30 : vector<8x32xf32>
    %32 = vector.extract_strided_slice %6 {offsets = [0, 1], sizes = [8, 1], strides = [1, 1]} : vector<8x8xf32> to vector<8x1xf32>
    %33 = vector.extract_strided_slice %6 {offsets = [0, 5], sizes = [8, 1], strides = [1, 1]} : vector<8x8xf32> to vector<8x1xf32>
    %34 = tpu.transpose %33, [1, 0] : vector<8x1xf32> -> vector<1x8xf32>
    %35 = vector.broadcast %32 : vector<8x1xf32> to vector<8x8xf32>
    %36 = vector.broadcast %34 : vector<1x8xf32> to vector<8x8xf32>
    %37 = arith.addf %35, %36 : vector<8x8xf32>
    %cst_11 = arith.constant 0.000000e+00 : f32
    %38 = vector.broadcast %cst_11 : f32 to vector<8x8xf32>
    %39 = arith.cmpf oge, %37, %38 : vector<8x8xf32>
    %cst_12 = arith.constant 2.000000e-01 : f32
    %40 = vector.broadcast %cst_12 : f32 to vector<8x8xf32>
    %41 = arith.mulf %40, %37 : vector<8x8xf32>
    %42 = arith.select %39, %37, %41 : vector<8x8xi1>, vector<8x8xf32>
    %cst_13 = arith.constant dense<0xFF800000> : vector<8xf32>
    %43 = vector.multi_reduction <maximumf>, %42, %cst_13 [1] : vector<8x8xf32> to vector<8xf32>
    %44 = vector.shape_cast %43 : vector<8xf32> to vector<8x1xf32>
    %45 = vector.broadcast %44 : vector<8x1xf32> to vector<8x8xf32>
    %46 = arith.subf %42, %45 : vector<8x8xf32>
    %47 = math.exp %46 : vector<8x8xf32>
    %cst_14 = arith.constant dense<0.000000e+00> : vector<8xf32>
    %48 = vector.multi_reduction <add>, %47, %cst_14 [1] : vector<8x8xf32> to vector<8xf32>
    %49 = vector.shape_cast %48 : vector<8xf32> to vector<8x1xf32>
    %50 = vector.extract_strided_slice %4 {offsets = [0, 32], sizes = [8, 32], strides = [1, 1]} : vector<8x128xf32> to vector<8x32xf32>
    %51 = arith.truncf %47 : vector<8x8xf32> to vector<8x8xbf16>
    %52 = arith.truncf %50 : vector<8x32xf32> to vector<8x32xbf16>
    %cst_15 = arith.constant dense<0.000000e+00> : vector<8x32xf32>
    %53 = tpu.matmul %51, %52, %cst_15 {dimension_numbers = #tpu.dot_dimension_numbers<[1], [0], [0], [1], [0, 0, 1, 1], [], []>} : vector<8x8xbf16>, vector<8x32xbf16>, vector<8x32xf32> -> vector<8x32xf32>
    %54 = tpu.reciprocal %49 {approx = true} : vector<8x1xf32> -> vector<8x1xf32>
    %55 = vector.broadcast %54 : vector<8x1xf32> to vector<8x32xf32>
    %56 = arith.mulf %53, %55 : vector<8x32xf32>
    %57 = vector.extract_strided_slice %6 {offsets = [0, 2], sizes = [8, 1], strides = [1, 1]} : vector<8x8xf32> to vector<8x1xf32>
    %58 = vector.extract_strided_slice %6 {offsets = [0, 6], sizes = [8, 1], strides = [1, 1]} : vector<8x8xf32> to vector<8x1xf32>
    %59 = tpu.transpose %58, [1, 0] : vector<8x1xf32> -> vector<1x8xf32>
    %60 = vector.broadcast %57 : vector<8x1xf32> to vector<8x8xf32>
    %61 = vector.broadcast %59 : vector<1x8xf32> to vector<8x8xf32>
    %62 = arith.addf %60, %61 : vector<8x8xf32>
    %cst_16 = arith.constant 0.000000e+00 : f32
    %63 = vector.broadcast %cst_16 : f32 to vector<8x8xf32>
    %64 = arith.cmpf oge, %62, %63 : vector<8x8xf32>
    %cst_17 = arith.constant 2.000000e-01 : f32
    %65 = vector.broadcast %cst_17 : f32 to vector<8x8xf32>
    %66 = arith.mulf %65, %62 : vector<8x8xf32>
    %67 = arith.select %64, %62, %66 : vector<8x8xi1>, vector<8x8xf32>
    %cst_18 = arith.constant dense<0xFF800000> : vector<8xf32>
    %68 = vector.multi_reduction <maximumf>, %67, %cst_18 [1] : vector<8x8xf32> to vector<8xf32>
    %69 = vector.shape_cast %68 : vector<8xf32> to vector<8x1xf32>
    %70 = vector.broadcast %69 : vector<8x1xf32> to vector<8x8xf32>
    %71 = arith.subf %67, %70 : vector<8x8xf32>
    %72 = math.exp %71 : vector<8x8xf32>
    %cst_19 = arith.constant dense<0.000000e+00> : vector<8xf32>
    %73 = vector.multi_reduction <add>, %72, %cst_19 [1] : vector<8x8xf32> to vector<8xf32>
    %74 = vector.shape_cast %73 : vector<8xf32> to vector<8x1xf32>
    %75 = vector.extract_strided_slice %4 {offsets = [0, 64], sizes = [8, 32], strides = [1, 1]} : vector<8x128xf32> to vector<8x32xf32>
    %76 = arith.truncf %72 : vector<8x8xf32> to vector<8x8xbf16>
    %77 = arith.truncf %75 : vector<8x32xf32> to vector<8x32xbf16>
    %cst_20 = arith.constant dense<0.000000e+00> : vector<8x32xf32>
    %78 = tpu.matmul %76, %77, %cst_20 {dimension_numbers = #tpu.dot_dimension_numbers<[1], [0], [0], [1], [0, 0, 1, 1], [], []>} : vector<8x8xbf16>, vector<8x32xbf16>, vector<8x32xf32> -> vector<8x32xf32>
    %79 = tpu.reciprocal %74 {approx = true} : vector<8x1xf32> -> vector<8x1xf32>
    %80 = vector.broadcast %79 : vector<8x1xf32> to vector<8x32xf32>
    %81 = arith.mulf %78, %80 : vector<8x32xf32>
    %82 = vector.extract_strided_slice %6 {offsets = [0, 3], sizes = [8, 1], strides = [1, 1]} : vector<8x8xf32> to vector<8x1xf32>
    %83 = vector.extract_strided_slice %6 {offsets = [0, 7], sizes = [8, 1], strides = [1, 1]} : vector<8x8xf32> to vector<8x1xf32>
    %84 = tpu.transpose %83, [1, 0] : vector<8x1xf32> -> vector<1x8xf32>
    %85 = vector.broadcast %82 : vector<8x1xf32> to vector<8x8xf32>
    %86 = vector.broadcast %84 : vector<1x8xf32> to vector<8x8xf32>
    %87 = arith.addf %85, %86 : vector<8x8xf32>
    %cst_21 = arith.constant 0.000000e+00 : f32
    %88 = vector.broadcast %cst_21 : f32 to vector<8x8xf32>
    %89 = arith.cmpf oge, %87, %88 : vector<8x8xf32>
    %cst_22 = arith.constant 2.000000e-01 : f32
    %90 = vector.broadcast %cst_22 : f32 to vector<8x8xf32>
    %91 = arith.mulf %90, %87 : vector<8x8xf32>
    %92 = arith.select %89, %87, %91 : vector<8x8xi1>, vector<8x8xf32>
    %cst_23 = arith.constant dense<0xFF800000> : vector<8xf32>
    %93 = vector.multi_reduction <maximumf>, %92, %cst_23 [1] : vector<8x8xf32> to vector<8xf32>
    %94 = vector.shape_cast %93 : vector<8xf32> to vector<8x1xf32>
    %95 = vector.broadcast %94 : vector<8x1xf32> to vector<8x8xf32>
    %96 = arith.subf %92, %95 : vector<8x8xf32>
    %97 = math.exp %96 : vector<8x8xf32>
    %cst_24 = arith.constant dense<0.000000e+00> : vector<8xf32>
    %98 = vector.multi_reduction <add>, %97, %cst_24 [1] : vector<8x8xf32> to vector<8xf32>
    %99 = vector.shape_cast %98 : vector<8xf32> to vector<8x1xf32>
    %100 = vector.extract_strided_slice %4 {offsets = [0, 96], sizes = [8, 32], strides = [1, 1]} : vector<8x128xf32> to vector<8x32xf32>
    %101 = arith.truncf %97 : vector<8x8xf32> to vector<8x8xbf16>
    %102 = arith.truncf %100 : vector<8x32xf32> to vector<8x32xbf16>
    %cst_25 = arith.constant dense<0.000000e+00> : vector<8x32xf32>
    %103 = tpu.matmul %101, %102, %cst_25 {dimension_numbers = #tpu.dot_dimension_numbers<[1], [0], [0], [1], [0, 0, 1, 1], [], []>} : vector<8x8xbf16>, vector<8x32xbf16>, vector<8x32xf32> -> vector<8x32xf32>
    %104 = tpu.reciprocal %99 {approx = true} : vector<8x1xf32> -> vector<8x1xf32>
    %105 = vector.broadcast %104 : vector<8x1xf32> to vector<8x32xf32>
    %106 = arith.mulf %103, %105 : vector<8x32xf32>
    %107 = tpu.concatenate %31, %56, %81, %106 in 1 : vector<8x32xf32>, vector<8x32xf32>, vector<8x32xf32>, vector<8x32xf32> -> vector<8x128xf32>
    %c0_26 = arith.constant 0 : index
    %c0_27 = arith.constant 0 : index
    %108 = vector.load %arg4[%c0_26, %c0_27] : memref<1x128xf32, #tpu.memory_space<vmem>>, vector<1x128xf32>
    %109 = vector.broadcast %108 : vector<1x128xf32> to vector<8x128xf32>
    %110 = arith.addf %107, %109 : vector<8x128xf32>
    %c0_28 = arith.constant 0 : index
    %c0_29 = arith.constant 0 : index
    %111 = vector.load %arg5[%c0_28, %c0_29] : memref<8x128xf32, #tpu.memory_space<vmem>>, vector<8x128xf32>
    tpu.vector_store %arg5[%c0_28, %c0_29], %110 {strides = array<i32>} : memref<8x128xf32, #tpu.memory_space<vmem>>, vector<8x128xf32>,
    return
  }
  func.func @transform_0(%arg0: i32) -> (i32, i32) {
    %c0_i32 = arith.constant 0 : i32
    %c0_i32_0 = arith.constant 0 : i32
    %c0_i32_1 = arith.constant 0 : i32
    return %c0_i32, %c0_i32_0 : i32, i32
  }
  func.func @transform_1(%arg0: i32) -> (i32, i32) {
    %c0_i32 = arith.constant 0 : i32
    %c0_i32_0 = arith.constant 0 : i32
    %c0_i32_1 = arith.constant 0 : i32
    return %c0_i32, %c0_i32_0 : i32, i32
  }
  func.func @transform_2(%arg0: i32) -> (i32, i32) {
    %c0_i32 = arith.constant 0 : i32
    %c0_i32_0 = arith.constant 0 : i32
    %c0_i32_1 = arith.constant 0 : i32
    return %c0_i32, %c0_i32_0 : i32, i32
  }
  func.func @transform_3(%arg0: i32) -> (i32, i32) {
    %c0_i32 = arith.constant 0 : i32
    %c0_i32_0 = arith.constant 0 : i32
    %c0_i32_1 = arith.constant 0 : i32
    return %c0_i32, %c0_i32_0 : i32, i32
  }
  func.func @transform_4(%arg0: i32) -> (i32, i32) {
    %c0_i32 = arith.constant 0 : i32
    %c0_i32_0 = arith.constant 0 : i32
    %c0_i32_1 = arith.constant 0 : i32
    return %c0_i32, %c0_i32_0 : i32, i32
  }
}

</mosaic_0001>

<bundles_post_ra>
// kernel: tpu_custom_call.1
= control target key start
LH: loop header
LB: loop body
LE: loop exit
PB: predicated region body
PF: predicated region fallthrough
CT: control target
= control target key end

     0   :  { %v734_v2 = vmov 0.0|0.0   ;;  %vm735_vm0 = vmmov 0   ;;  %v736_v4 = vmov 0.0   ;;  %s849_s0 = inlined_call_operand.vmem [shape: f32[8,16], index: 0, kind: input, shape index: {}]   ;;  %s850_s1 = inlined_call_operand.vmem [shape: f32[16,128], index: 1, kind: input, shape index: {}]   ;;  %s851_s2 = inlined_call_operand.vmem [shape: f32[16,8], index: 2, kind: input, shape index: {}]   ;;  %s852_s3 = inlined_call_operand.vmem [shape: f32[1,128], index: 3, kind: input, shape index: {}]   ;;  %s853_s4 = inlined_call_operand.hbm [shape: f32[8,128], index: 4, kind: output, shape index: {}]  }
   0x1   :  { %v68_v0 = vld [vmem:[%s851_s2] sm:$0xff]  ;;  %v69_v1 = vld [vmem:[%s851_s2 + $0x8] sm:$0xff]  ;;  %672 = vmatprep.subr.bf16.mxu1 %v734_v2  ;;  %645 = vmatprep.mubr.msk.f32.mxu1 %vm735_vm0, %v736_v4 }
   0x2   :  { %v673_v3 = vpack.c.bf16 %v69_v1, %v68_v0  ;;  %v21_v5 = vld [vmem:[%s850_s1] sm:$0xff]  ;;  %v22_v6 = vld [vmem:[%s850_s1 + $0x8] sm:$0xff] }
   0x3   :  { %9 = vsyncpa [#allocation3], 0  ;;  %v19_v7 = vld [vmem:[%s849_s0] sm:$0xff]  ;;  %635 = vmatprep.subr.bf16.mxu0 %v736_v4  ;;  %v23_v8 = vpack.c.bf16 %v22_v6, %v21_v5  ;;  %637 = vmatprep.mubr.msk.bf16.mxu0 %vm735_vm0, %v736_v4  ;;  %vm24_vm1 = vcmask 130048   ;;  %v737_v10 = vmov 1   ;;  %v738_v11 = vmov 0  }
   0x4   :  { %674 = vmatpush3.bf16.msra.mxu1 %v673_v3  ;;  %v20_v9 = vpack.c.bf16 %v19_v7, %v19_v7  ;;  %691 = vset.pattern.permute.xlu1 %v737_v10  ;;  %s739_s0 = smov 122   ;;  %s740_s1 = smov 124   ;;  %vm206_vm2 = vcmask 1043456   ;;  %v743_v20 = vmov 2   ;;  %v744_v21 = vmov 3  }
   0x5   :  { %636 = vmatpush3.bf16.msra.mxu0 %v23_v8  ;;  %648 = vmatprep.subr.bf16.mxu1 %v736_v4  ;;  %s741_s2 = smov 121   ;;  %s742_s25 = smov 123   ;;  %v183_v30 = vlaneseq  ;;  %vm191_vm3 = vcmask 64512   ;;  %vm586_vm8 = vcmask 261120   ;;  %vm588_vm9 = vcmask 523264  }
   0x6   :  { %654 = vmatprep.subr.bf16.mxu0 %v736_v4  ;;  %690 = vset.pattern.permute.xlu0 %v738_v11  ;;  %s745_s26 = smov 96   ;;  %s746_s27 = smov 32   ;;  %vm590_vm10 = vcmask 785408  }
   0x7   :  { %646 = vmatmul.mubr.msk.f32.vlgmr.msra.gmra.mrb[0].mxu1 %vm24_vm1, %v19_v7  ;;  %v184_v31 = vshrl.u32 %v183_v30, 7  ;;  %s747_s28 = smov 64   ;;  %s748_s5 = smov [#allocation2]  }
   0x8   :  { %638 = vmatmul.mubr.msk.bf16.vlgmr.msra.gmra.mrb[0].mxu0 %vm24_vm1, %v20_v9  ;;  %650 = vmatprep.mubr.msk.bf16.mxu1 %vm735_vm0, %v736_v4  ;;  %s607_s6 = sshll.u32 %s748_s5, 4  ;;  %s608_s6 = int_to_ptr.vmem [resolvable:$true] %s607_s6 }
   0x9   :  { %656 = vmatprep.mubr.msk.bf16.mxu0 %vm735_vm0, %v736_v4  ;;  %v185_v33 = vsub.s32 0, %v184_v31  ;;  %s710_s7 = scalar_lea.vmem %s608_s6, 128  ;;  %p715_p1 = scmp.lt.s32.totalorder %s608_s6, %s608_s6 }
   0xa   :  { %p711_p0 = scmp.ne.s32.totalorder %s608_s6, %s710_s7  ;;  %p716_p2 = scmp.lt.s32.totalorder %s710_s7, %s710_s7 }
   0xc   :  { %p717_p3 = por %p716_p2, %p715_p1 }
   0xe   :  { %p718_p4 = pnand %p717_p3, %p711_p0 }
  0xda   :  { %v139_v12 = vpop.f32.mrb[0].mxu1 }
  0xdb   :  { %360 = vrot.lane.b32.xlu1 %v139_v12, %s739_s0  ;;  %144 = vrot.lane.b32.xlu0 %v139_v12, %s740_s1  ;;  %v647_v13 = vpop.f32.mrb[1].mxu1  ;;  %v62_v14 = vpop.f32.mrb[0].mxu0 }
  0xdc   :  { %v800_v15 = vpack.c.bf16 %v62_v14, %v62_v14  ;;  %v639_v16 = vpop.f32.mrb[1].mxu0 }
  0xdd   :  { %v65_v17 = vpop.f32.mrb[2].mxu0 }
  0xde   :  { %v640_v18 = vpop.f32.mrb[3].mxu0  ;;  %v208_v19 = vsel %vm206_vm2, %v800_v15, 0 }
  0xdf   :  { %467 = vrot.lane.b32.xlu1 %v139_v12, %s741_s2  ;;  %252 = vrot.lane.b32.xlu0 %v139_v12, %s742_s25 }
  0xe0   :  { %649 = vmatpush3.bf16.msra.mxu1 %v208_v19 }
  0xe1   :  { %660 = vmatprep.subr.bf16.mxu1 %v736_v4 }
  0xe3   :  { %288 = vperm.xlu1 %691, %v139_v12   ;;  %180 = vperm.xlu0 %690, %v139_v12  }
  0xe7   :  { %692 = vset.pattern.permute.xlu1 %v743_v20  ;;  %693 = vset.pattern.permute.xlu0 %v744_v21 }
  0xe8   :  { %396 = vperm.xlu1 %692, %v139_v12   ;;  %503 = vperm.xlu0 %693, %v139_v12  }
  0xec   :  { %310 = vrot.lane.b32.xlu1 %v800_v15, %s745_s26 }
 0x14d   :  { %v361_v22 = vpop.permute.xlu1 %360  ;;  %v145_v23 = vpop.permute.xlu0 %144 }
 0x14e   :  { %147 = vxpose.xlu1.b32.start.end [1/1] (short) (narrow) %v145_v23, 8 }
 0x151   :  { %v468_v24 = vpop.permute.xlu1 %467  ;;  %v253_v25 = vpop.permute.xlu0 %252 }
 0x152   :  { %255 = vxpose.xlu0.b32.start.end [1/1] (short) (narrow) %v253_v25, 8  ;;  %470 = vxpose.xlu1.b32.start.end [1/1] (short) (narrow) %v468_v24, 8 }
 0x156   :  { %363 = vxpose.xlu0.b32.start.end [1/1] (short) (narrow) %v361_v22, 8 }
 0x162   :  { %v289_v26 = vpop.permute.xlu1 %288  ;;  %v181_v32 = vpop.permute.xlu0 %180 }
 0x167   :  { %v397_v27 = vpop.permute.xlu1 %396  ;;  %v504_v34 = vpop.permute.xlu0 %503 }
 0x16b   :  { %v311_v28 = vpop.permute.xlu1 %310 }
 0x16c   :  { %v316_v29 = vsel %vm206_vm2, %v311_v28, 0 }
 0x16d   :  { %655 = vmatpush3.bf16.msra.mxu0 %v316_v29 }
 0x16e   :  { %666 = vmatprep.subr.bf16.mxu0 %v736_v4 }
 0x1ce   :  { %v163_v35 = vpop.trf.xlu1 }
 0x1cf   :  { %v186_v36 = vrot.slane %v163_v35, %v185_v33 }
 0x1d1   :  { %v187_v37 = vadd.f32 %v186_v36, %v181_v32 }
 0x1d2   :  { %v271_v38 = vpop.trf.xlu0  ;;  %v486_v39 = vpop.trf.xlu1 }
 0x1d3   :  { %v294_v40 = vrot.slane %v271_v38, %v185_v33  ;;  %v509_v41 = vrot.slane %v486_v39, %v185_v33  ;;  %vm188_vm4 = vcmp.ge.f32.partialorder %v187_v37, 0.0  ;;  %v189_v42 = vmul.f32 0.2, %v187_v37 }
 0x1d5   :  { %v295_v43 = vadd.f32 %v294_v40, %v289_v26  ;;  %v510_v44 = vadd.f32 %v509_v41, %v504_v34  ;;  %v190_v45 = vsel %vm188_vm4, %v187_v37, %v189_v42 }
 0x1d6   :  { %v379_v46 = vpop.trf.xlu0  ;;  %v192_v47 = vsel %vm191_vm3, %v190_v45, -inf }
 0x1d7   :  { %v402_v48 = vrot.slane %v379_v46, %v185_v33  ;;  %193 = vmax.xlane.f32.xlu0 %v192_v47  ;;  %vm296_vm5 = vcmp.ge.f32.partialorder %v295_v43, 0.0  ;;  %v297_v49 = vmul.f32 0.2, %v295_v43  ;;  %vm511_vm6 = vcmp.ge.f32.partialorder %v510_v44, 0.0 }
 0x1d8   :  { %v512_v50 = vmul.f32 0.2, %v510_v44 }
 0x1d9   :  { %v403_v51 = vadd.f32 %v402_v48, %v397_v27  ;;  %v298_v52 = vsel %vm296_vm5, %v295_v43, %v297_v49 }
 0x1da   :  { %v299_v53 = vsel %vm191_vm3, %v298_v52, -inf  ;;  %v513_v54 = vsel %vm511_vm6, %v510_v44, %v512_v50 }
 0x1db   :  { %300 = vmax.xlane.f32.xlu1 %v299_v53  ;;  %v514_v55 = vsel %vm191_vm3, %v513_v54, -inf  ;;  %vm404_vm7 = vcmp.ge.f32.partialorder %v403_v51, 0.0  ;;  %v405_v56 = vmul.f32 0.2, %v403_v51 }
 0x1dc   :  { %515 = vmax.xlane.f32.xlu0 %v514_v55 }
 0x1dd   :  { %v406_v57 = vsel %vm404_vm7, %v403_v51, %v405_v56 }
 0x1de   :  { %v407_v58 = vsel %vm191_vm3, %v406_v57, -inf }
 0x1df   :  { %408 = vmax.xlane.f32.xlu1 %v407_v58 }
 0x1f0   :  { %524 = vrot.lane.b32.xlu1 %v800_v15, %s746_s27 }
 0x1f2   :  { %417 = vrot.lane.b32.xlu0 %v800_v15, %s747_s28 }
 0x264   :  { %v194_v59 = vpop.xlane.xlu0 %193 }
 0x265   :  { %v195_v60 = vsub.f32 %v190_v45, %v194_v59 }
 0x267   :  { %v196_v61 = vmul.f32 1.442695, %v195_v60 }
 0x268   :  { %v301_v62 = vpop.xlane.xlu1 %300 }
 0x269   :  { %694 = vpow2.f32 %v196_v61  ;;  %v516_v63 = vpop.xlane.xlu0 %515  ;;  %v302_v0 = vsub.f32 %v298_v52, %v301_v62 }
 0x26a   :  { %v517_v1 = vsub.f32 %v513_v54, %v516_v63  ;;  %v621_v54 = vld [vmem:[%s852_s3] ss:$0 sm:$0xff] }
 0x26b   :  { %v303_v2 = vmul.f32 1.442695, %v302_v0 }
 0x26c   :  { %v518_v3 = vmul.f32 1.442695, %v517_v1  ;;  %v409_v5 = vpop.xlane.xlu1 %408 }
 0x26d   :  { %696 = vpow2.f32 %v303_v2  ;;  %v410_v6 = vsub.f32 %v406_v57, %v409_v5  ;;  %v418_v9 = vpop.permute.xlu0 %417 }
 0x26e   :  { %698 = vpow2.f32 %v518_v3  ;;  %v423_v12 = vsel %vm206_vm2, %v418_v9, 0 }
 0x26f   :  { %v411_v7 = vmul.f32 1.442695, %v410_v6 }
 0x270   :  { %v525_v14 = vpop.permute.xlu1 %524 }
 0x271   :  { %700 = vpow2.f32 %v411_v7  ;;  %v530_v19 = vsel %vm206_vm2, %v525_v14, 0 }
 0x273   :  { %v695_v8 = vpop.eup %694 }
 0x274   :  { %v198_v10 = vsel %vm191_vm3, %v695_v8, 0.0  ;;  %v201_v11 = vpack.c.bf16 %v695_v8, %v695_v8 }
 0x275   :  { %199 = vadd.xlane.f32.xlu1 %v198_v10 }
 0x276   :  { %651 = vmatmul.mubr.msk.bf16.vlgmr.msra.gmra.mrb[4].mxu1 %vm191_vm3, %v201_v11 }
 0x277   :  { %v697_v13 = vpop.eup %696  ;;  %661 = vmatpush3.bf16.msra.mxu1 %v423_v12  ;;  %662 = vmatprep.mubr.msk.bf16.mxu1 %vm735_vm0, %v736_v4 }
 0x278   :  { %v699_v15 = vpop.eup %698  ;;  %v305_v16 = vsel %vm191_vm3, %v697_v13, 0.0  ;;  %v308_v17 = vpack.c.bf16 %v697_v13, %v697_v13 }
 0x279   :  { %v520_v18 = vsel %vm191_vm3, %v699_v15, 0.0  ;;  %306 = vadd.xlane.f32.xlu0 %v305_v16  ;;  %v523_v23 = vpack.c.bf16 %v699_v15, %v699_v15 }
 0x27a   :  { %521 = vadd.xlane.f32.xlu1 %v520_v18  ;;  %657 = vmatmul.mubr.msk.bf16.vlgmr.msra.gmra.mrb[4].mxu0 %vm191_vm3, %v308_v17 }
 0x27b   :  { %v701_v20 = vpop.eup %700  ;;  %667 = vmatpush3.bf16.msra.mxu0 %v530_v19  ;;  %668 = vmatprep.mubr.msk.bf16.mxu0 %vm735_vm0, %v736_v4 }
 0x27c   :  { %v413_v21 = vsel %vm191_vm3, %v701_v20, 0.0  ;;  %v416_v22 = vpack.c.bf16 %v701_v20, %v701_v20 }
 0x27d   :  { %414 = vadd.xlane.f32.xlu0 %v413_v21 }
 0x27e   :  { %663 = vmatmul.mubr.msk.bf16.vlgmr.msra.gmra.mrb[8].mxu1 %vm191_vm3, %v416_v22 }
 0x282   :  { %669 = vmatmul.mubr.msk.bf16.vlgmr.msra.gmra.mrb[8].mxu0 %vm191_vm3, %v523_v23 }
 0x302   :  { %v200_v24 = vpop.xlane.xlu1 %199 }
 0x303   :  { %702 = vrcp.f32 %v200_v24 }
 0x306   :  { %v307_v25 = vpop.xlane.xlu0 %306 }
 0x307   :  { %704 = vrcp.f32 %v307_v25  ;;  %v522_v27 = vpop.xlane.xlu1 %521 }
 0x30a   :  { %v415_v26 = vpop.xlane.xlu0 %414 }
 0x30b   :  { %706 = vrcp.f32 %v415_v26 }
 0x30c   :  { %708 = vrcp.f32 %v522_v27 }
 0x30d   :  { %v703_v28 = vpop.eup %702 }
 0x311   :  { %v705_v33 = vpop.eup %704 }
 0x315   :  { %v707_v39 = vpop.eup %706 }
 0x316   :  { %v709_v45 = vpop.eup %708 }
 0x349   :  { %v244_v29 = vpop.f32.mrb[4].mxu1 }
 0x34a   :  { %v251_v30 = vmul.f32 %v703_v28, %v244_v29  ;;  %v652_v4 = vpop.f32.mrb[5].mxu1 }
 0x34b   :  { %v247_v31 = vpop.f32.mrb[6].mxu1 }
 0x34c   :  { %v653_v32 = vpop.f32.mrb[7].mxu1 }
 0x34d   :  { %v352_v34 = vpop.f32.mrb[4].mxu0 }
 0x34e   :  { %v359_v35 = vmul.f32 %v705_v33, %v352_v34  ;;  %v658_v36 = vpop.f32.mrb[5].mxu0 }
 0x34f   :  { %v355_v37 = vpop.f32.mrb[6].mxu0 }
 0x350   :  { %575 = vrot.lane.b32.xlu0 %v359_v35, %s746_s27  ;;  %v659_v38 = vpop.f32.mrb[7].mxu0 }
 0x351   :  { %v459_v40 = vpop.f32.mrb[8].mxu1 }
 0x352   :  { %v466_v41 = vmul.f32 %v707_v39, %v459_v40  ;;  %v664_v42 = vpop.f32.mrb[9].mxu1 }
 0x353   :  { %v462_v43 = vpop.f32.mrb[10].mxu1 }
 0x354   :  { %579 = vrot.lane.b32.xlu1 %v466_v41, %s747_s28  ;;  %v665_v44 = vpop.f32.mrb[11].mxu1 }
 0x355   :  { %v566_v46 = vpop.f32.mrb[8].mxu0 }
 0x356   :  { %v573_v47 = vmul.f32 %v709_v45, %v566_v46  ;;  %v670_v48 = vpop.f32.mrb[9].mxu0 }
 0x357   :  { %v569_v49 = vpop.f32.mrb[10].mxu0 }
 0x358   :  { %583 = vrot.lane.b32.xlu1 %v573_v47, %s745_s26  ;;  %v671_v50 = vpop.f32.mrb[11].mxu0 }
 0x3c2   :  { %v576_v51 = vpop.permute.xlu0 %575 }
 0x3c3   :  { %v587_v53 = vsel %vm586_vm8, %v251_v30, %v576_v51 }
 0x3c6   :  { %v580_v52 = vpop.permute.xlu1 %579 }
 0x3c7   :  { %v589_v55 = vsel %vm588_vm9, %v587_v53, %v580_v52 }
 0x3ca   :  { %v584_v56 = vpop.permute.xlu1 %583 }
 0x3cb   :  { %v591_v57 = vsel %vm590_vm10, %v589_v55, %v584_v56 }
 0x3cc   :  { %v599_v58 = vadd.f32 %v621_v54, %v591_v57 }
 0x3ce   :  { %600 = vst [vmem:[#allocation2] sm:$0xff] %v599_v58 }
 0x3cf   :  { %721 = shalt.err (!%p718_p4)
}
 0x3d0   :  { %s722_s10 = scalar_lea.hbm %s853_s4, 128 }
 0x3d1   :  { %p723_p5 = scmp.ne.s32.totalorder %s853_s4, %s722_s10  ;;  %p726_p6 = scmp.lt.u32.totalorder %s722_s10, %s853_s4 }
 0x3d3   :  { %p728_p7 = pnand %p726_p6, %p723_p5 }
 0x3d5   :  { %731 = shalt.err (!%p728_p7)
}
 0x3d6   :  { %610 = dma.vmem_to_hbm [thread:$0]  %s608_s6, 128, %s853_s4, [#allocation3]  }
 0x3d7   :  { %732 = dma.done.wait [#allocation3], 128  }
 0x3d8   :  { %733 = vsyncadd [#allocation3], 4294967168 }
 0x3d9   :  { %614 = vsyncpa [#allocation3], 1 }

</bundles_post_ra>
